<compile_context>
chip_gen: v7x
topology: tpu7x:2x2x1
jax: 0.10.0
libtpu: 0.0.40
codegen_flags: <defaults>
</compile_context>

<pallas_src>
import functools

import jax
import jax.numpy as jnp
from jax.experimental import pallas as pl
from jax.experimental.pallas import tpu as pltpu

_MiB = 1024 * 1024


def _round_up(x, m):
    return ((x + m - 1) // m) * m


def _tpu_generation():
    try:
        kind = jax.devices()[0].device_kind.lower()
    except Exception:
        kind = ""
    for gen in ("v7", "v6", "v5"):
        if gen in kind:
            return gen
    return "unknown"


# Per-generation tiling / VMEM policy.
_GEN_CFG = {
    "v5":      dict(tile_m=256,  tile_n=128, vmem_cap=100 * _MiB, resident_w=24 * _MiB),
    "v6":      dict(tile_m=1024, tile_n=512, vmem_cap=100 * _MiB, resident_w=24 * _MiB),
    "v7":      dict(tile_m=512,  tile_n=256, vmem_cap=52 * _MiB,  resident_w=10 * _MiB),
    "unknown": dict(tile_m=512,  tile_n=256, vmem_cap=56 * _MiB,  resident_w=16 * _MiB),
}


def prepare_ffn_params(w1, b1, w2, b2, compute_dtype=jnp.bfloat16):
    """Pad to 128-lane multiples and cast ONCE, outside the per-call hot path."""
    E, H = w1.shape
    E_p, H_p = _round_up(E, 128), _round_up(H, 128)
    w1p = jnp.pad(w1.astype(compute_dtype), ((0, E_p - E), (0, H_p - H)))
    w2p = jnp.pad(w2.astype(compute_dtype), ((0, H_p - H), (0, E_p - E)))
    b1p = jnp.pad(b1.astype(jnp.float32), (0, H_p - H)).reshape(1, H_p)
    b2p = jnp.pad(b2.astype(jnp.float32), (0, E_p - E)).reshape(1, E_p)
    return w1p, b1p, w2p, b2p


def _pick_tile_n(desired, H_p):
    t = max(128, min((desired // 128) * 128, H_p))
    while H_p % t != 0:
        t -= 128
    return t


def _silu(h):
    # sigmoid = 1 / (1 + exp(-h)); exp + approximate reciprocal both run on the
    # (otherwise idle) EUP slot, keeping the VALU free.
    return h * pl.reciprocal(1.0 + jnp.exp(-h), approx=True)


def _ffn_resident_kernel(x_ref, w1_ref, b1_ref, w2_ref, b2_ref, o_ref, *, compute_dtype):
    """Weights fully VMEM-resident; 1-D grid over row tiles only."""
    x = x_ref[...]
    if x.dtype != compute_dtype:
        x = x.astype(compute_dtype)
    h = jnp.dot(x, w1_ref[...], preferred_element_type=jnp.float32) + b1_ref[...]
    h = _silu(h)
    y = jnp.dot(h.astype(compute_dtype), w2_ref[...], preferred_element_type=jnp.float32)
    o_ref[...] = (y + b2_ref[...]).astype(o_ref.dtype)


def _ffn_streaming_kernel(x_ref, w1_ref, b1_ref, w2_ref, b2_ref, o_ref, acc_ref,
                          *, n_steps, compute_dtype):
    """Hidden dim streamed in tile_n slabs; f32 VMEM accumulator; fused finalize."""
    n = pl.program_id(1)
    x = x_ref[...]
    if x.dtype != compute_dtype:
        x = x.astype(compute_dtype)
    h = jnp.dot(x, w1_ref[...], preferred_element_type=jnp.float32) + b1_ref[...]
    h = _silu(h)
    contrib = jnp.dot(h.astype(compute_dtype), w2_ref[...],
                      preferred_element_type=jnp.float32)

    if n_steps == 1:
        o_ref[...] = (contrib + b2_ref[...]).astype(o_ref.dtype)
    else:
        @pl.when(n == 0)
        def _():
            acc_ref[...] = contrib            # first slab: write (no zero-init pass)

        @pl.when(jnp.logical_and(n > 0, n < n_steps - 1))
        def _():
            acc_ref[...] += contrib

        # Fused finalize: fold last slab + b2 straight into the output store
        # (saves one tile_m x E_p f32 accumulator round trip per row tile).
        @pl.when(n == n_steps - 1)
        def _():
            o_ref[...] = (acc_ref[...] + contrib + b2_ref[...]).astype(o_ref.dtype)


def feed_forward(x, w1, b1, w2, b2, *, tile_m=None, tile_n=None,
                 compute_dtype=jnp.bfloat16, out_dtype=None):
    """y = silu(x @ W1 + b1) @ W2 + b2 on (B, T, E); dropout = identity (inference).

    Weights may be raw ((E,H)/(H,E), any float dtype) or pre-prepared with
    `prepare_ffn_params`; pre-preparing avoids a per-call weight HBM round trip.
    """
    B, T, E = x.shape
    M = B * T
    out_dtype = x.dtype if out_dtype is None else out_dtype

    prepared = (w1.dtype == compute_dtype and b1.ndim == 2
                and w1.shape[0] % 128 == 0 and w1.shape[1] % 128 == 0)
    if not prepared:
        w1, b1, w2, b2 = prepare_ffn_params(w1, b1, w2, b2, compute_dtype)
    E_p, H_p = w1.shape

    cfg = _GEN_CFG[_tpu_generation()]
    cb = jnp.dtype(compute_dtype).itemsize
    ob = jnp.dtype(out_dtype).itemsize

    # ---- row tile (multiple of 8 sublanes, no larger than the padded M) ----
    if tile_m is None:
        tile_m = cfg["tile_m"]
    tile_m = max(8, _round_up(min(tile_m, _round_up(M, 8)), 8))

    w_bytes = 2 * E_p * H_p * cb          # one copy of W1 + W2 (bf16)

    def resident_vmem(tm):
        return (2 * tm * E_p * cb         # x tiles (double-buffered, bf16)
                + 2 * tm * E_p * ob       # output tiles
                + 2 * w_bytes             # resident W1 + W2 (2 buffers, conservative)
                + tm * H_p * 4            # h intermediate (f32)
                + 4 * (H_p + E_p) * 4)    # biases

    def streaming_vmem(tm, tn):
        return (2 * tm * E_p * cb
                + 2 * tm * E_p * ob
                + 8 * E_p * tn * cb       # W1 + W2 slabs, double-buffered
                + tm * E_p * 4            # f32 accumulator scratch
                + tm * tn * 4             # h slab (f32)
                + 4 * (tn + E_p) * 4)

    use_resident = (w_bytes <= cfg["resident_w"]
                    and resident_vmem(tile_m) <= cfg["vmem_cap"])

    if use_resident:
        while tile_m > 64 and resident_vmem(tile_m) > cfg["vmem_cap"]:
            tile_m = _round_up(tile_m // 2, 8)
        est = resident_vmem(tile_m)
    else:
        if tile_n is None:
            tile_n = cfg["tile_n"]
        tile_n = _pick_tile_n(tile_n, H_p)
        while tile_m > 64 and streaming_vmem(tile_m, tile_n) > cfg["vmem_cap"]:
            tile_m = _round_up(tile_m // 2, 8)
        est = streaming_vmem(tile_m, tile_n)

    M_p = _round_up(M, tile_m)
    n_row = M_p // tile_m

    # Flatten + cast x to the MXU dtype in the wrapper; zero-pad rows/lanes
    # (zero-padded W1 columns -> silu(0)=0 -> zero-padded W2 rows contribute 0).
    x2 = x.reshape(M, E).astype(compute_dtype)
    if M_p != M or E_p != E:
        x2 = jnp.pad(x2, ((0, M_p - M), (0, E_p - E)))

    vmem_limit = int(min(max(32 * _MiB, (est * 5) // 4), cfg["vmem_cap"]))

    flops = 4 * M_p * E_p * H_p
    trans = M_p * H_p

    if use_resident:
        cost = pl.CostEstimate(
            flops=flops, transcendentals=trans,
            bytes_accessed=(x2.size * cb + w_bytes + (H_p + E_p) * 4
                            + M_p * E_p * ob))
        out = pl.pallas_call(
            functools.partial(_ffn_resident_kernel, compute_dtype=compute_dtype),
            out_shape=jax.ShapeDtypeStruct((M_p, E_p), out_dtype),
            grid_spec=pltpu.PrefetchScalarGridSpec(
                num_scalar_prefetch=0,
                grid=(n_row,),
                in_specs=[
                    pl.BlockSpec((tile_m, E_p), lambda i: (i, 0)),   # x row tile
                    pl.BlockSpec((E_p, H_p), lambda i: (0, 0)),      # W1 resident
                    pl.BlockSpec((1, H_p), lambda i: (0, 0)),        # b1 resident
                    pl.BlockSpec((H_p, E_p), lambda i: (0, 0)),      # W2 resident
                    pl.BlockSpec((1, E_p), lambda i: (0, 0)),        # b2 resident
                ],
                out_specs=pl.BlockSpec((tile_m, E_p), lambda i: (i, 0)),
            ),
            compiler_params=pltpu.CompilerParams(
                dimension_semantics=("parallel",),
                vmem_limit_bytes=vmem_limit),
            cost_estimate=cost,
        )(x2, w1, b1, w2, b2)
    else:
        n_steps = H_p // tile_n
        cost = pl.CostEstimate(
            flops=flops, transcendentals=trans,
            bytes_accessed=(x2.size * cb
                            + n_row * w_bytes                   # weights re-streamed / row tile
                            + n_row * (H_p + E_p) * 4
                            + M_p * E_p * ob))
        out = pl.pallas_call(
            functools.partial(_ffn_streaming_kernel, n_steps=n_steps,
                              compute_dtype=compute_dtype),
            out_shape=jax.ShapeDtypeStruct((M_p, E_p), out_dtype),
            grid_spec=pltpu.PrefetchScalarGridSpec(
                num_scalar_prefetch=0,
                grid=(n_row, n_steps),
                in_specs=[
                    pl.BlockSpec((tile_m, E_p), lambda i, n: (i, 0)),   # x row tile
                    pl.BlockSpec((E_p, tile_n), lambda i, n: (0, n)),   # W1 column slab
                    pl.BlockSpec((1, tile_n), lambda i, n: (0, n)),     # b1 slab
                    pl.BlockSpec((tile_n, E_p), lambda i, n: (n, 0)),   # W2 row slab
                    pl.BlockSpec((1, E_p), lambda i, n: (0, 0)),        # b2 (resident)
                ],
                out_specs=pl.BlockSpec((tile_m, E_p), lambda i, n: (i, 0)),
                scratch_shapes=[pltpu.VMEM((tile_m, E_p), jnp.float32)],
            ),
            compiler_params=pltpu.CompilerParams(
                dimension_semantics=("parallel", "arbitrary"),
                vmem_limit_bytes=vmem_limit),
            cost_estimate=cost,
        )(x2, w1, b1, w2, b2)

    return out[:M, :E].reshape(B, T, E)


def init_params(key, n_embd, dtype=jnp.float32):
    """PyTorch nn.Linear default init U(-1/sqrt(fan_in), 1/sqrt(fan_in))."""
    hidden = 2 * n_embd
    k1, k2, k3, k4 = jax.random.split(key, 4)
    bound1 = 1.0 / (n_embd ** 0.5)
    bound2 = 1.0 / (hidden ** 0.5)
    # stored as (in_features, out_features) — transposed vs. PyTorch's (out, in)
    w1 = jax.random.uniform(k1, (n_embd, hidden), dtype, -bound1, bound1)
    b1 = jax.random.uniform(k2, (hidden,), dtype, -bound1, bound1)
    w2 = jax.random.uniform(k3, (hidden, n_embd), dtype, -bound2, bound2)
    b2 = jax.random.uniform(k4, (n_embd,), dtype, -bound2, bound2)
    return w1, b1, w2, b2


if __name__ == "__main__":
    B, T, n_embd = 2, 8, 32
    key = jax.random.PRNGKey(0)
    kx, kp = jax.random.split(key)

    x = jax.random.normal(kx, (B, T, n_embd), dtype=jnp.float32)
    w1, b1, w2, b2 = init_params(kp, n_embd)

    # Hot-path usage: prepare (pad + cast) the weights once, reuse every call.
    w1p, b1p, w2p, b2p = prepare_ffn_params(w1, b1, w2, b2)
    y = jax.block_until_ready(feed_forward(x, w1p, b1p, w2p, b2p))

    # Raw-weight path (per-call pad/cast) must agree with the prepared path.
    y_raw = jax.block_until_ready(feed_forward(x, w1, b1, w2, b2))
    assert jnp.allclose(y, y_raw, atol=1e-6, rtol=1e-6), "prepared vs raw mismatch"

    # Reference with the same compute recipe (bf16 MXU operands, f32 accumulation).
    xf = x.reshape(-1, n_embd)
    h = jnp.dot(xf.astype(jnp.bfloat16), w1.astype(jnp.bfloat16),
                preferred_element_type=jnp.float32) + b1
    h = h * jax.nn.sigmoid(h)
    y_ref = (jnp.dot(h.astype(jnp.bfloat16), w2.astype(jnp.bfloat16),
                     preferred_element_type=jnp.float32) + b2).astype(x.dtype)
    y_ref = y_ref.reshape(B, T, n_embd)
    # approx-reciprocal sigmoid + bf16 rounding => modest tolerance
    assert jnp.allclose(y, y_ref, atol=1e-2, rtol=1e-2), "mismatch vs bf16-recipe reference"

    # Loose sanity check against pure-f32 math.
    h32 = xf @ w1 + b1
    h32 = h32 * jax.nn.sigmoid(h32)
    y32 = (h32 @ w2 + b2).reshape(B, T, n_embd)
    assert jnp.allclose(y, y32, atol=1e-1, rtol=1e-1), "mismatch vs f32 reference"

    print("KERNEL_OK")
</pallas_src>

<mosaic_0001>
module attributes {stable_mosaic.version = 11 : i64} {
  func.func @_ffn_resident_kernel(%arg0: i32, %arg1: memref<16x128xbf16, #tpu.memory_space<vmem>>, %arg2: memref<128x128xbf16, #tpu.memory_space<vmem>>, %arg3: memref<1x128xf32, #tpu.memory_space<vmem>>, %arg4: memref<128x128xbf16, #tpu.memory_space<vmem>>, %arg5: memref<1x128xf32, #tpu.memory_space<vmem>>, %arg6: memref<16x128xf32, #tpu.memory_space<vmem>>) attributes {dimension_semantics = [#tpu.dimension_semantics<parallel>], iteration_bounds = array<i64: 1>, scalar_prefetch = 0 : i64, scratch_operands = 0 : i64, tpu.core_type = #tpu.core_type<tc>, window_params = [{transform_indices = @transform_0, window_bounds = array<i64: 16, 128>}, {pipeline_mode = #tpu.pipeline_mode<synchronous>, transform_indices = @transform_1, window_bounds = array<i64: 128, 128>}, {pipeline_mode = #tpu.pipeline_mode<synchronous>, transform_indices = @transform_2, window_bounds = array<i64: 1, 128>}, {pipeline_mode = #tpu.pipeline_mode<synchronous>, transform_indices = @transform_3, window_bounds = array<i64: 128, 128>}, {pipeline_mode = #tpu.pipeline_mode<synchronous>, transform_indices = @transform_4, window_bounds = array<i64: 1, 128>}, {transform_indices = @transform_5, window_bounds = array<i64: 16, 128>}]} {
    %c0 = arith.constant 0 : index
    %c0_0 = arith.constant 0 : index
    %0 = vector.load %arg1[%c0, %c0_0] : memref<16x128xbf16, #tpu.memory_space<vmem>>, vector<16x128xbf16>
    %c0_1 = arith.constant 0 : index
    %c0_2 = arith.constant 0 : index
    %1 = vector.load %arg2[%c0_1, %c0_2] : memref<128x128xbf16, #tpu.memory_space<vmem>>, vector<128x128xbf16>
    %cst = arith.constant dense<0.000000e+00> : vector<16x128xf32>
    %2 = tpu.matmul %0, %1, %cst {dimension_numbers = #tpu.dot_dimension_numbers<[1], [0], [0], [1], [0, 0, 1, 1], [], []>} : vector<16x128xbf16>, vector<128x128xbf16>, vector<16x128xf32> -> vector<16x128xf32>
    %c0_3 = arith.constant 0 : index
    %c0_4 = arith.constant 0 : index
    %3 = vector.load %arg3[%c0_3, %c0_4] : memref<1x128xf32, #tpu.memory_space<vmem>>, vector<1x128xf32>
    %4 = vector.broadcast %3 : vector<1x128xf32> to vector<16x128xf32>
    %5 = arith.addf %2, %4 : vector<16x128xf32>
    %cst_5 = arith.constant 0.000000e+00 : f32
    %6 = vector.broadcast %cst_5 : f32 to vector<16x128xf32>
    %7 = arith.subf %6, %5 : vector<16x128xf32>
    %8 = math.exp %7 : vector<16x128xf32>
    %cst_6 = arith.constant 1.000000e+00 : f32
    %9 = vector.broadcast %cst_6 : f32 to vector<16x128xf32>
    %10 = arith.addf %9, %8 : vector<16x128xf32>
    %11 = tpu.reciprocal %10 {approx = true} : vector<16x128xf32> -> vector<16x128xf32>
    %12 = arith.mulf %5, %11 : vector<16x128xf32>
    %13 = arith.truncf %12 : vector<16x128xf32> to vector<16x128xbf16>
    %c0_7 = arith.constant 0 : index
    %c0_8 = arith.constant 0 : index
    %14 = vector.load %arg4[%c0_7, %c0_8] : memref<128x128xbf16, #tpu.memory_space<vmem>>, vector<128x128xbf16>
    %cst_9 = arith.constant dense<0.000000e+00> : vector<16x128xf32>
    %15 = tpu.matmul %13, %14, %cst_9 {dimension_numbers = #tpu.dot_dimension_numbers<[1], [0], [0], [1], [0, 0, 1, 1], [], []>} : vector<16x128xbf16>, vector<128x128xbf16>, vector<16x128xf32> -> vector<16x128xf32>
    %c0_10 = arith.constant 0 : index
    %c0_11 = arith.constant 0 : index
    %16 = vector.load %arg5[%c0_10, %c0_11] : memref<1x128xf32, #tpu.memory_space<vmem>>, vector<1x128xf32>
    %17 = vector.broadcast %16 : vector<1x128xf32> to vector<16x128xf32>
    %18 = arith.addf %15, %17 : vector<16x128xf32>
    %c0_12 = arith.constant 0 : index
    %c0_13 = arith.constant 0 : index
    %19 = vector.load %arg6[%c0_12, %c0_13] : memref<16x128xf32, #tpu.memory_space<vmem>>, vector<16x128xf32>
    tpu.vector_store %arg6[%c0_12, %c0_13], %18 {strides = array<i32>} : memref<16x128xf32, #tpu.memory_space<vmem>>, vector<16x128xf32>,
    return
  }
  func.func @transform_0(%arg0: i32) -> (i32, i32) {
    %c0_i32 = arith.constant 0 : i32
    %c0_i32_0 = arith.constant 0 : i32
    return %arg0, %c0_i32 : i32, i32
  }
  func.func @transform_1(%arg0: i32) -> (i32, i32) {
    %c0_i32 = arith.constant 0 : i32
    %c0_i32_0 = arith.constant 0 : i32
    %c0_i32_1 = arith.constant 0 : i32
    return %c0_i32, %c0_i32_0 : i32, i32
  }
  func.func @transform_2(%arg0: i32) -> (i32, i32) {
    %c0_i32 = arith.constant 0 : i32
    %c0_i32_0 = arith.constant 0 : i32
    %c0_i32_1 = arith.constant 0 : i32
    return %c0_i32, %c0_i32_0 : i32, i32
  }
  func.func @transform_3(%arg0: i32) -> (i32, i32) {
    %c0_i32 = arith.constant 0 : i32
    %c0_i32_0 = arith.constant 0 : i32
    %c0_i32_1 = arith.constant 0 : i32
    return %c0_i32, %c0_i32_0 : i32, i32
  }
  func.func @transform_4(%arg0: i32) -> (i32, i32) {
    %c0_i32 = arith.constant 0 : i32
    %c0_i32_0 = arith.constant 0 : i32
    %c0_i32_1 = arith.constant 0 : i32
    return %c0_i32, %c0_i32_0 : i32, i32
  }
  func.func @transform_5(%arg0: i32) -> (i32, i32) {
    %c0_i32 = arith.constant 0 : i32
    %c0_i32_0 = arith.constant 0 : i32
    return %arg0, %c0_i32 : i32, i32
  }
}

</mosaic_0001>

<bundles_post_ra>
// kernel: tpu_custom_call.1
= control target key start
LH: loop header
LB: loop body
LE: loop exit
PB: predicated region body
PF: predicated region fallthrough
CT: control target
= control target key end

     0   :  { %10 = vsyncpa [#allocation3], 0  ;;  %s644_s0 = inlined_call_operand.hbm [shape: bf16[16,128], index: 0, kind: input, shape index: {}]   ;;  %s645_s1 = inlined_call_operand.hbm [shape: bf16[128,128], index: 1, kind: input, shape index: {}]   ;;  %s646_s2 = inlined_call_operand.vmem [shape: f32[1,128], index: 2, kind: input, shape index: {}]   ;;  %s647_s3 = inlined_call_operand.hbm [shape: bf16[128,128], index: 3, kind: input, shape index: {}]   ;;  %s648_s4 = inlined_call_operand.vmem [shape: f32[1,128], index: 4, kind: input, shape index: {}]   ;;  %s649_s5 = inlined_call_operand.hbm [shape: f32[16,128], index: 5, kind: output, shape index: {}]  }
   0x1   :  { %11 = vsyncpa [#allocation6], 0 }
   0x2   :  { %12 = vsyncpa [#allocation4], 0  ;;  %s534_s18 = smov [#allocation5]   ;;  %s535_s20 = smov [#allocation2]  }
   0x3   :  { %s30_s19 = sshll.u32 %s534_s18, 4  ;;  %s18_s21 = sshll.u32 %s535_s20, 4  ;;  %s31_s19 = int_to_ptr.vmem [resolvable:$true] %s30_s19  ;;  %s574_s21 = int_to_ptr.vmem [resolvable:$true] %s18_s21 }
   0x4   :  { %s440_s24 = scalar_lea.hbm %s645_s1, 1024 }
   0x5   :  { %p441_p0 = scmp.ne.s32.totalorder %s645_s1, %s440_s24  ;;  %p444_p1 = scmp.lt.u32.totalorder %s440_s24, %s645_s1 }
   0x7   :  { %p446_p2 = pnand %p444_p1, %p441_p0 }
   0x9   :  { %449 = shalt.err (!%p446_p2)
}
   0xa   :  { %s450_s29 = scalar_lea.vmem %s31_s19, 1024  ;;  %p455_p4 = scmp.lt.s32.totalorder %s31_s19, %s31_s19 }
   0xb   :  { %p451_p3 = scmp.ne.s32.totalorder %s31_s19, %s450_s29  ;;  %p456_p5 = scmp.lt.s32.totalorder %s450_s29, %s450_s29 }
   0xd   :  { %p457_p6 = por %p456_p5, %p455_p4 }
   0xf   :  { %p458_p7 = pnand %p457_p6, %p451_p3 }
  0x11   :  { %461 = shalt.err (!%p458_p7)
}
  0x12   :  { %s536_s30 = smov 64   ;;  %s537_s6 = smov 4  }
  0x13   :  { %36 = dma.hbm_to_vmem [thread:$0]  %s645_s1, 1024, %s31_s19, [#allocation6], %s536_s30, %s536_s30, %s537_s6  }
  0x14   :  { %s462_s11 = scalar_lea.hbm %s644_s0, 128 }
  0x15   :  { %p463_p8 = scmp.ne.s32.totalorder %s644_s0, %s462_s11  ;;  %p466_p9 = scmp.lt.u32.totalorder %s462_s11, %s644_s0 }
  0x17   :  { %p468_p10 = pnand %p466_p9, %p463_p8 }
  0x19   :  { %471 = shalt.err (!%p468_p10)
}
  0x1a   :  { %s472_s16 = scalar_lea.vmem %s574_s21, 128  ;;  %p477_p12 = scmp.lt.s32.totalorder %s574_s21, %s574_s21 }
  0x1b   :  { %p473_p11 = scmp.ne.s32.totalorder %s574_s21, %s472_s16  ;;  %p478_p13 = scmp.lt.s32.totalorder %s472_s16, %s472_s16 }
  0x1d   :  { %p479_p0 = por %p478_p13, %p477_p12 }
  0x1f   :  { %p480_p1 = pnand %p479_p0, %p473_p11 }
  0x21   :  { %483 = shalt.err (!%p480_p1)
}
  0x22   :  { %24 = dma.hbm_to_vmem [thread:$0]  %s644_s0, 128, %s574_s21, [#allocation3], %s536_s30, %s536_s30, %s537_s6  }
  0x23   :  { %s538_s18 = smov [#allocation7]   ;;  %s484_s23 = scalar_lea.hbm %s647_s3, 1024 }
  0x24   :  { %s44_s19 = sshll.u32 %s538_s18, 4  ;;  %p485_p2 = scmp.ne.s32.totalorder %s647_s3, %s484_s23  ;;  %s45_s19 = int_to_ptr.vmem [resolvable:$true] %s44_s19 }
  0x25   :  { %p488_p3 = scmp.lt.u32.totalorder %s484_s23, %s647_s3 }
  0x27   :  { %p490_p4 = pnand %p488_p3, %p485_p2 }
  0x29   :  { %493 = shalt.err (!%p490_p4)
}
  0x2a   :  { %s494_s28 = scalar_lea.vmem %s45_s19, 1024  ;;  %p499_p6 = scmp.lt.s32.totalorder %s45_s19, %s45_s19 }
  0x2b   :  { %p495_p5 = scmp.ne.s32.totalorder %s45_s19, %s494_s28  ;;  %p500_p7 = scmp.lt.s32.totalorder %s494_s28, %s494_s28 }
  0x2d   :  { %p501_p8 = por %p500_p7, %p499_p6 }
  0x2f   :  { %p502_p9 = pnand %p501_p8, %p495_p5 }
  0x31   :  { %505 = shalt.err (!%p502_p9)
}
  0x32   :  { %50 = dma.hbm_to_vmem [thread:$0]  %s647_s3, 1024, %s45_s19, [#allocation6], %s536_s30, %s536_s30, %s537_s6  }
  0x33   :  { %528 = dma.done.wait [#allocation3], 128  }
  0x34   :  { %529 = vsyncadd [#allocation3], 4294967168 }
  0x35   :  { %530 = dma.done.wait [#allocation6], 2048  }
  0x36   :  { %531 = vsyncadd [#allocation6], 4294965248  ;;  %v539_v0 = vmov 0.0   ;;  %vm540_vm0 = vmmov 0   ;;  %v415_v1 = vld [vmem:[#allocation5] sm:$0xff]   ;;  %v416_v2 = vld [vmem:[#allocation5 + $0x8] sm:$0xff]  }
  0x37   :  { %365 = vmatprep.subr.bf16.mxu0 %v539_v0  ;;  %381 = vmatprep.mubr.msk.bf16.mxu0 %vm540_vm0, %v539_v0  ;;  %v417_v3 = vld [vmem:[#allocation5 + $0x10] sm:$0xff]   ;;  %v418_v4 = vld [vmem:[#allocation5 + $0x18] sm:$0xff]   ;;  %v419_v5 = vld [vmem:[#allocation5 + $0x20] sm:$0xff]   ;;  %s541_s6 = smov [#allocation8]  }
  0x38   :  { %385 = vmatprep.subr.bf16.mxu1 %v539_v0  ;;  %401 = vmatprep.mubr.msk.bf16.mxu1 %vm540_vm0, %v539_v0  ;;  %v420_v6 = vld [vmem:[#allocation5 + $0x28] sm:$0xff]   ;;  %v421_v7 = vld [vmem:[#allocation5 + $0x30] sm:$0xff]   ;;  %v422_v8 = vld [vmem:[#allocation5 + $0x38] sm:$0xff]   ;;  %s315_s7 = sshll.u32 %s541_s6, 4  ;;  %s316_s7 = int_to_ptr.vmem [resolvable:$true] %s315_s7 }
  0x39   :  { %366 = vmatpush3.bf16.msra.mxu0 %v415_v1  ;;  %v423_v9 = vld [vmem:[#allocation2] sm:$0xff]   ;;  %v424_v10 = vld [vmem:[#allocation7] sm:$0xff]   ;;  %v425_v11 = vld [vmem:[#allocation7 + $0x8] sm:$0xff]   ;;  %s506_s8 = scalar_lea.vmem %s316_s7, 256  ;;  %p511_p11 = scmp.lt.s32.totalorder %s316_s7, %s316_s7 }
  0x3a   :  { %367 = vmatprep.subr.bf16.mxu0 %v539_v0  ;;  %386 = vmatpush3.bf16.msra.mxu1 %v424_v10  ;;  %v426_v12 = vld [vmem:[#allocation7 + $0x10] sm:$0xff]   ;;  %v427_v13 = vld [vmem:[#allocation7 + $0x18] sm:$0xff]   ;;  %v428_v14 = vld [vmem:[#allocation7 + $0x20] sm:$0xff]   ;;  %p507_p10 = scmp.ne.s32.totalorder %s316_s7, %s506_s8  ;;  %p512_p12 = scmp.lt.s32.totalorder %s506_s8, %s506_s8 }
  0x3b   :  { %387 = vmatprep.subr.bf16.mxu1 %v539_v0  ;;  %v429_v15 = vld [vmem:[#allocation7 + $0x28] sm:$0xff]   ;;  %v430_v16 = vld [vmem:[#allocation7 + $0x30] sm:$0xff]   ;;  %v431_v17 = vld [vmem:[#allocation7 + $0x38] sm:$0xff]  }
  0x3c   :  { %v328_v18 = vld [vmem:[%s646_s2] ss:$0 sm:$0xff]  ;;  %p513_p13 = por %p512_p12, %p511_p11 }
  0x3d   :  { %368 = vmatpush3.bf16.msra.mxu0 %v416_v2  ;;  %v338_v38 = vld [vmem:[%s648_s4] ss:$0 sm:$0xff] }
  0x3e   :  { %369 = vmatprep.subr.bf16.mxu0 %v539_v0  ;;  %388 = vmatpush3.bf16.msra.mxu1 %v425_v11  ;;  %p514_p0 = pnand %p513_p13, %p507_p10 }
  0x3f   :  { %389 = vmatprep.subr.bf16.mxu1 %v539_v0 }
  0x41   :  { %370 = vmatpush3.bf16.msra.mxu0 %v417_v3 }
  0x42   :  { %371 = vmatprep.subr.bf16.mxu0 %v539_v0  ;;  %390 = vmatpush3.bf16.msra.mxu1 %v426_v12 }
  0x43   :  { %391 = vmatprep.subr.bf16.mxu1 %v539_v0 }
  0x45   :  { %372 = vmatpush3.bf16.msra.mxu0 %v418_v4 }
  0x46   :  { %373 = vmatprep.subr.bf16.mxu0 %v539_v0  ;;  %392 = vmatpush3.bf16.msra.mxu1 %v427_v13 }
  0x47   :  { %393 = vmatprep.subr.bf16.mxu1 %v539_v0 }
  0x49   :  { %374 = vmatpush3.bf16.msra.mxu0 %v419_v5 }
  0x4a   :  { %375 = vmatprep.subr.bf16.mxu0 %v539_v0  ;;  %394 = vmatpush3.bf16.msra.mxu1 %v428_v14 }
  0x4b   :  { %395 = vmatprep.subr.bf16.mxu1 %v539_v0 }
  0x4d   :  { %376 = vmatpush3.bf16.msra.mxu0 %v420_v6 }
  0x4e   :  { %377 = vmatprep.subr.bf16.mxu0 %v539_v0  ;;  %396 = vmatpush3.bf16.msra.mxu1 %v429_v15 }
  0x4f   :  { %397 = vmatprep.subr.bf16.mxu1 %v539_v0 }
  0x51   :  { %378 = vmatpush3.bf16.msra.mxu0 %v421_v7 }
  0x52   :  { %379 = vmatprep.subr.bf16.mxu0 %v539_v0  ;;  %398 = vmatpush3.bf16.msra.mxu1 %v430_v16 }
  0x53   :  { %399 = vmatprep.subr.bf16.mxu1 %v539_v0 }
  0x55   :  { %380 = vmatpush3.bf16.msra.mxu0 %v422_v8 }
  0x56   :  { %400 = vmatpush3.bf16.msra.mxu1 %v431_v17 }
  0x58   :  { %382 = vmatmul.mubr.bf16.vlgmr.msra.gmra.mrb[0].mxu0 %v423_v9 }
 0x12b   :  { %v176_v19 = vpop.f32.mrb[0].mxu0 }
 0x12c   :  { %v177_v20 = vadd.f32 %v328_v18, %v176_v19  ;;  %v383_v21 = vpop.f32.mrb[1].mxu0 }
 0x12d   :  { %v179_v22 = vpop.f32.mrb[2].mxu0 }
 0x12e   :  { %v183_v23 = vsub.f32 0.0, %v177_v20  ;;  %v180_v24 = vadd.f32 %v328_v18, %v179_v22  ;;  %v384_v25 = vpop.f32.mrb[3].mxu0 }
 0x130   :  { %v185_v26 = vmul.f32 1.442695, %v183_v23  ;;  %v184_v27 = vsub.f32 0.0, %v180_v24 }
 0x132   :  { %432 = vpow2.f32 %v185_v26  ;;  %v187_v28 = vmul.f32 1.442695, %v184_v27 }
 0x134   :  { %434 = vpow2.f32 %v187_v28 }
 0x13c   :  { %v433_v29 = vpop.eup %432 }
 0x13d   :  { %v189_v30 = vadd.f32 1.0, %v433_v29 }
 0x13e   :  { %v435_v31 = vpop.eup %434 }
 0x13f   :  { %436 = vrcp.f32 %v189_v30  ;;  %v190_v32 = vadd.f32 1.0, %v435_v31 }
 0x141   :  { %438 = vrcp.f32 %v190_v32 }
 0x149   :  { %v437_v33 = vpop.eup %436 }
 0x14a   :  { %v193_v35 = vmul.f32 %v437_v33, %v177_v20 }
 0x14b   :  { %v439_v34 = vpop.eup %438 }
 0x14c   :  { %v194_v36 = vmul.f32 %v439_v34, %v180_v24 }
 0x14e   :  { %v195_v37 = vpack.c.bf16 %v194_v36, %v193_v35 }
 0x150   :  { %402 = vmatmul.mubr.bf16.vlgmr.msra.gmra.mrb[0].mxu1 %v195_v37 }
 0x223   :  { %v301_v39 = vpop.f32.mrb[0].mxu1 }
 0x224   :  { %v302_v40 = vadd.f32 %v338_v38, %v301_v39  ;;  %v403_v41 = vpop.f32.mrb[1].mxu1 }
 0x225   :  { %v304_v42 = vpop.f32.mrb[2].mxu1 }
 0x226   :  { %308 = vst [vmem:[#allocation8] sm:$0xff] %v302_v40  ;;  %v305_v43 = vadd.f32 %v338_v38, %v304_v42  ;;  %v404_v44 = vpop.f32.mrb[3].mxu1 }
 0x228   :  { %309 = vst [vmem:[#allocation8 + $0x8] sm:$0xff] %v305_v43 }
 0x229   :  { %517 = shalt.err (!%p514_p0)
}
 0x22a   :  { %s518_s10 = scalar_lea.hbm %s649_s5, 256 }
 0x22b   :  { %p519_p1 = scmp.ne.s32.totalorder %s649_s5, %s518_s10  ;;  %p522_p2 = scmp.lt.u32.totalorder %s518_s10, %s649_s5 }
 0x22d   :  { %p524_p3 = pnand %p522_p2, %p519_p1 }
 0x22f   :  { %527 = shalt.err (!%p524_p3)
}
 0x230   :  { %s542_s15 = smov 128   ;;  %s543_s16 = smov 8  }
 0x231   :  { %321 = dma.vmem_to_hbm [thread:$0]  %s316_s7, 256, %s649_s5, [#allocation4], %s542_s15, %s542_s15, %s543_s16  }
 0x232   :  { %532 = dma.done.wait [#allocation4], 256  }
 0x233   :  { %533 = vsyncadd [#allocation4], 4294967040 }
 0x234   :  { %325 = vsyncpa [#allocation3], 1 }
 0x235   :  { %326 = vsyncpa [#allocation6], 1 }
 0x236   :  { %327 = vsyncpa [#allocation4], 1 }

</bundles_post_ra>
